<compile_context>
chip_gen: v5e
topology: v5e:2x2
jax: 0.10.0
libtpu: 0.0.40
codegen_flags: <defaults>
</compile_context>

<pallas_src>
import jax
import jax.numpy as jnp
from jax.experimental import pallas as pl
from jax.experimental.pallas import tpu as pltpu


def _round_up(x, m):
    return ((x + m - 1) // m) * m


def linear_kernel(x_ref, w_ref, b_ref, o_ref, acc_ref):
    """Tiled o = x @ W_t + b with f32 accumulator resident across the K grid axis."""
    k = pl.program_id(2)

    @pl.when(k == 0)
    def _():
        acc_ref[...] = jnp.zeros_like(acc_ref)

    acc_ref[...] += jnp.dot(
        x_ref[...], w_ref[...], preferred_element_type=jnp.float32
    )

    @pl.when(k == pl.num_programs(2) - 1)
    def _():
        o_ref[...] = (acc_ref[...] + b_ref[...]).astype(o_ref.dtype)


def simple_linear_net(x_nchw, w, b):
    """Forward pass of SimpleLinearNet.

    x_nchw: (B, C, H, W) float32
    w:      (N, K) torch-style nn.Linear weight (N = num_classes, K = C*H*W)
    b:      (N,)   bias
    returns (B, N)
    """
    B = x_nchw.shape[0]
    N, K = w.shape
    x2d = x_nchw.reshape(B, K)  # same flattening order as torch's .view(-1, size)

    # Tile sizes: sublane-dense batch tile, lane-dense N/K tiles. K tile capped so that
    # x-tile + w-tile (double-buffered) stay well inside the VMEM scoped limit even on v7x.
    tm = min(_round_up(B, 8), 128)
    tn = min(_round_up(N, 128), 512)
    tk = min(_round_up(K, 128), 2048)

    M_pad = _round_up(B, tm)
    N_pad = _round_up(N, tn)
    K_pad = _round_up(K, tk)

    # Zero padding is exact (padded rows/cols contribute 0 to the dot product).
    x_p = jnp.zeros((M_pad, K_pad), x2d.dtype).at[:B, :K].set(x2d)
    w_t = jnp.zeros((K_pad, N_pad), w.dtype).at[:K, :N].set(w.T)  # (K, N) padded
    b_p = jnp.zeros((1, N_pad), b.dtype).at[0, :N].set(b)

    grid = (M_pad // tm, N_pad // tn, K_pad // tk)

    out_padded = pl.pallas_call(
        linear_kernel,
        out_shape=jax.ShapeDtypeStruct((M_pad, N_pad), x2d.dtype),
        grid_spec=pltpu.PrefetchScalarGridSpec(
            num_scalar_prefetch=0,
            grid=grid,
            in_specs=[
                pl.BlockSpec((tm, tk), lambda i, j, k: (i, k)),  # x tile
                pl.BlockSpec((tk, tn), lambda i, j, k: (k, j)),  # W.T tile
                pl.BlockSpec((1, tn), lambda i, j, k: (0, j)),   # bias tile
            ],
            out_specs=pl.BlockSpec((tm, tn), lambda i, j, k: (i, j)),
            scratch_shapes=[pltpu.VMEM((tm, tn), jnp.float32)],
        ),
        compiler_params=pltpu.CompilerParams(
            dimension_semantics=("parallel", "parallel", "arbitrary"),
        ),
    )(x_p, w_t, b_p)

    # Slice padded rows/columns back off.
    return out_padded[:B, :N]


if __name__ == "__main__":
    # Small shapes consistent with the module: B=2, C=3, H=W=16 -> size=768, 10 classes.
    B, C, H, W = 2, 3, 16, 16
    num_classes = 10
    size = C * H * W

    key = jax.random.PRNGKey(0)
    kx, kw, kb = jax.random.split(key, 3)

    x = jax.random.normal(kx, (B, C, H, W), dtype=jnp.float32)
    # Deterministic params mimicking nn.Linear(size, num_classes): W (N, K), b (N,)
    bound = 1.0 / jnp.sqrt(size)
    W_param = jax.random.uniform(kw, (num_classes, size), jnp.float32, -bound, bound)
    b_param = jax.random.uniform(kb, (num_classes,), jnp.float32, -bound, bound)

    out = simple_linear_net(x, W_param, b_param)
    out = jax.block_until_ready(out)

    # Reference check in plain JAX (same math as torch: x.view(-1, size) @ W.T + b)
    ref = x.reshape(B, size) @ W_param.T + b_param
    assert out.shape == (B, num_classes)
    assert jnp.allclose(out, ref, atol=1e-4, rtol=1e-4)

    print("KERNEL_OK")
</pallas_src>

<mosaic_0001>
module attributes {stable_mosaic.version = 11 : i64} {
  func.func @linear_kernel(%arg0: i32, %arg1: i32, %arg2: i32, %arg3: memref<8x768xf32, #tpu.memory_space<vmem>>, %arg4: memref<768x128xf32, #tpu.memory_space<vmem>>, %arg5: memref<1x128xf32, #tpu.memory_space<vmem>>, %arg6: memref<8x128xf32, #tpu.memory_space<vmem>>, %arg7: memref<8x128xf32, #tpu.memory_space<vmem>>) attributes {dimension_semantics = [#tpu.dimension_semantics<parallel>, #tpu.dimension_semantics<parallel>, #tpu.dimension_semantics<arbitrary>], iteration_bounds = array<i64: 1, 1, 1>, scalar_prefetch = 0 : i64, scratch_operands = 1 : i64, tpu.core_type = #tpu.core_type<tc>, window_params = [{transform_indices = @transform_0, window_bounds = array<i64: 8, 768>}, {transform_indices = @transform_1, window_bounds = array<i64: 768, 128>}, {transform_indices = @transform_2, window_bounds = array<i64: 1, 128>}, {transform_indices = @transform_3, window_bounds = array<i64: 8, 128>}]} {
    %c0_i32 = arith.constant 0 : i32
    %0 = arith.cmpi eq, %arg2, %c0_i32 : i32
    %1 = arith.extui %0 : i1 to i32
    %c0_i32_0 = arith.constant 0 : i32
    %2 = arith.cmpi ne, %1, %c0_i32_0 : i32
    scf.if %2 {
      %cst_10 = arith.constant 0.000000e+00 : f32
      %12 = vector.broadcast %cst_10 : f32 to vector<8x128xf32>
      %c0_11 = arith.constant 0 : index
      %c0_12 = arith.constant 0 : index
      %13 = vector.load %arg7[%c0_11, %c0_12] : memref<8x128xf32, #tpu.memory_space<vmem>>, vector<8x128xf32>
      tpu.vector_store %arg7[%c0_11, %c0_12], %12 {strides = array<i32>} : memref<8x128xf32, #tpu.memory_space<vmem>>, vector<8x128xf32>,
    } else {
    }
    %c0 = arith.constant 0 : index
    %c0_1 = arith.constant 0 : index
    %3 = vector.load %arg7[%c0, %c0_1] : memref<8x128xf32, #tpu.memory_space<vmem>>, vector<8x128xf32>
    %c0_2 = arith.constant 0 : index
    %c0_3 = arith.constant 0 : index
    %4 = vector.load %arg3[%c0_2, %c0_3] : memref<8x768xf32, #tpu.memory_space<vmem>>, vector<8x768xf32>
    %c0_4 = arith.constant 0 : index
    %c0_5 = arith.constant 0 : index
    %5 = vector.load %arg4[%c0_4, %c0_5] : memref<768x128xf32, #tpu.memory_space<vmem>>, vector<768x128xf32>
    %cst = arith.constant dense<0.000000e+00> : vector<8x128xf32>
    %6 = tpu.matmul %4, %5, %cst {dimension_numbers = #tpu.dot_dimension_numbers<[1], [0], [0], [1], [0, 0, 1, 1], [], []>} : vector<8x768xf32>, vector<768x128xf32>, vector<8x128xf32> -> vector<8x128xf32>
    %7 = arith.addf %3, %6 : vector<8x128xf32>
    %c0_6 = arith.constant 0 : index
    %c0_7 = arith.constant 0 : index
    %8 = vector.load %arg7[%c0_6, %c0_7] : memref<8x128xf32, #tpu.memory_space<vmem>>, vector<8x128xf32>
    tpu.vector_store %arg7[%c0_6, %c0_7], %7 {strides = array<i32>} : memref<8x128xf32, #tpu.memory_space<vmem>>, vector<8x128xf32>,
    %c0_i32_8 = arith.constant 0 : i32
    %9 = arith.cmpi eq, %arg2, %c0_i32_8 : i32
    %10 = arith.extui %9 : i1 to i32
    %c0_i32_9 = arith.constant 0 : i32
    %11 = arith.cmpi ne, %10, %c0_i32_9 : i32
    scf.if %11 {
      %c0_10 = arith.constant 0 : index
      %c0_11 = arith.constant 0 : index
      %12 = vector.load %arg7[%c0_10, %c0_11] : memref<8x128xf32, #tpu.memory_space<vmem>>, vector<8x128xf32>
      %c0_12 = arith.constant 0 : index
      %c0_13 = arith.constant 0 : index
      %13 = vector.load %arg5[%c0_12, %c0_13] : memref<1x128xf32, #tpu.memory_space<vmem>>, vector<1x128xf32>
      %14 = vector.broadcast %13 : vector<1x128xf32> to vector<8x128xf32>
      %15 = arith.addf %12, %14 : vector<8x128xf32>
      %c0_14 = arith.constant 0 : index
      %c0_15 = arith.constant 0 : index
      %16 = vector.load %arg6[%c0_14, %c0_15] : memref<8x128xf32, #tpu.memory_space<vmem>>, vector<8x128xf32>
      tpu.vector_store %arg6[%c0_14, %c0_15], %15 {strides = array<i32>} : memref<8x128xf32, #tpu.memory_space<vmem>>, vector<8x128xf32>,
    } else {
    }
    return
  }
  func.func @transform_0(%arg0: i32, %arg1: i32, %arg2: i32) -> (i32, i32) {
    %c0_i32 = arith.constant 0 : i32
    return %arg0, %arg2 : i32, i32
  }
  func.func @transform_1(%arg0: i32, %arg1: i32, %arg2: i32) -> (i32, i32) {
    %c0_i32 = arith.constant 0 : i32
    return %arg2, %arg1 : i32, i32
  }
  func.func @transform_2(%arg0: i32, %arg1: i32, %arg2: i32) -> (i32, i32) {
    %c0_i32 = arith.constant 0 : i32
    %c0_i32_0 = arith.constant 0 : i32
    return %c0_i32, %arg1 : i32, i32
  }
  func.func @transform_3(%arg0: i32, %arg1: i32, %arg2: i32) -> (i32, i32) {
    %c0_i32 = arith.constant 0 : i32
    return %arg0, %arg1 : i32, i32
  }
}

</mosaic_0001>

<bundles_post_ra>
// kernel: tpu_custom_call.1
= control target key start
LH: loop header
LB: loop body
LE: loop exit
PB: predicated region body
PF: predicated region fallthrough
CT: control target
= control target key end

     0   :  { %8 = vsyncpa [#allocation4], 0  ;;  %s424_s0 = inlined_call_operand.hbm [shape: f32[8,768], index: 0, kind: input, shape index: {}]   ;;  %s425_s1 = inlined_call_operand.hbm [shape: f32[768,128], index: 1, kind: input, shape index: {}]   ;;  %s426_s2 = inlined_call_operand.vmem [shape: f32[1,128], index: 2, kind: input, shape index: {}]   ;;  %s427_s3 = inlined_call_operand.hbm [shape: f32[8,128], index: 3, kind: output, shape index: {}]  }
   0x1   :  { %9 = vsyncpa [#allocation7], 0 }
   0x2   :  { %10 = vsyncpa [#allocation5], 0  ;;  %s16_s14 = sshll.u32 %s424_s0, 4  ;;  %s387_s15 = smov [#allocation3]   ;;  %s17_s14 = int_to_ptr.hbm [resolvable:$true] %s16_s14 }
   0x3   :  { %s18_s16 = sshll.u32 %s387_s15, 4  ;;  %s26_s19 = sshll.u32 %s425_s1, 4  ;;  %s19_s16 = int_to_ptr.vmem [resolvable:$true] %s18_s16  ;;  %s27_s19 = int_to_ptr.hbm [resolvable:$true] %s26_s19 }
   0x4   :  { %21 = dma.hbm_to_vmem [thread:$0]  %s17_s14, 768, %s19_s16, [#allocation4]  }
   0x5   :  { %s388_s20 = smov [#allocation6]   ;;  %s389_s22 = smov 128  }
   0x6   :  { %s28_s21 = sshll.u32 %s388_s20, 4  ;;  %s390_s23 = smov 8   ;;  %s29_s21 = int_to_ptr.vmem [resolvable:$true] %s28_s21 }
   0x7   :  { %34 = dma.hbm_to_vmem [thread:$0]  %s27_s19, 12288, %s29_s21, [#allocation7], %s389_s22, %s389_s22, %s390_s23  }
   0x8   :  { %381 = dma.done.wait [#allocation4], 768  }
   0x9   :  { %382 = vsyncadd [#allocation4], 4294966528 }
   0xa   :  { %383 = dma.done.wait [#allocation7], 12288  }
   0xb   :  { %384 = vsyncadd [#allocation7], 4294955008  ;;  %v72_v0 = vld [vmem:[#allocation6 + $0x78] sm:$0xff]  ;;  %v71_v1 = vld [vmem:[#allocation6 + $0x70] sm:$0xff]  ;;  %s391_s24 = smov [#allocation8]   ;;  %s292_s28 = sshll.u32 %s427_s3, 4  ;;  %s293_s28 = int_to_ptr.hbm [resolvable:$true] %s292_s28 }
   0xc   :  { %v88_v2 = vld [vmem:[#allocation6 + $0xf8] sm:$0xff]  ;;  %153 = vmatpush.msra.mxu0 %v72_v0  ;;  %v87_v3 = vld [vmem:[#allocation6 + $0xf0] sm:$0xff]  ;;  %v70_v4 = vld [vmem:[#allocation6 + $0x68] sm:$0xff]  ;;  %s290_s25 = sshll.u32 %s391_s24, 4  ;;  %s291_s25 = int_to_ptr.vmem [resolvable:$true] %s290_s25 }
   0xd   :  { %173 = vmatpush.msra.mxu1 %v88_v2  ;;  %v86_v5 = vld [vmem:[#allocation6 + $0xe8] sm:$0xff]  ;;  %v69_v6 = vld [vmem:[#allocation6 + $0x60] sm:$0xff]  ;;  %v68_v8 = vld [vmem:[#allocation6 + $0x58] sm:$0xff] }
   0xe   :  { %154 = vmatpush.msra.mxu0 %v71_v1  ;;  %v85_v7 = vld [vmem:[#allocation6 + $0xe0] sm:$0xff]  ;;  %v84_v9 = vld [vmem:[#allocation6 + $0xd8] sm:$0xff]  ;;  %v103_v11 = vld [vmem:[#allocation6 + $0x170] sm:$0xff] }
   0xf   :  { %174 = vmatpush.msra.mxu1 %v87_v3  ;;  %v104_v10 = vld [vmem:[#allocation6 + $0x178] sm:$0xff]  ;;  %v67_v13 = vld [vmem:[#allocation6 + $0x50] sm:$0xff]  ;;  %v102_v15 = vld [vmem:[#allocation6 + $0x168] sm:$0xff] }
  0x10   :  { %155 = vmatpush.msra.mxu0 %v70_v4  ;;  %v120_v12 = vld [vmem:[#allocation6 + $0x1f8] sm:$0xff]  ;;  %v83_v14 = vld [vmem:[#allocation6 + $0xd0] sm:$0xff]  ;;  %193 = vmatpush.msra.mxu2 %v104_v10  ;;  %v66_v17 = vld [vmem:[#allocation6 + $0x48] sm:$0xff] }
  0x11   :  { %175 = vmatpush.msra.mxu1 %v86_v5  ;;  %213 = vmatpush.msra.mxu3 %v120_v12  ;;  %v119_v16 = vld [vmem:[#allocation6 + $0x1f0] sm:$0xff]  ;;  %v82_v18 = vld [vmem:[#allocation6 + $0xc8] sm:$0xff]  ;;  %v101_v20 = vld [vmem:[#allocation6 + $0x160] sm:$0xff] }
  0x12   :  { %156 = vmatpush.msra.mxu0 %v69_v6  ;;  %194 = vmatpush.msra.mxu2 %v103_v11  ;;  %v118_v19 = vld [vmem:[#allocation6 + $0x1e8] sm:$0xff]  ;;  %v117_v21 = vld [vmem:[#allocation6 + $0x1e0] sm:$0xff]  ;;  %v100_v24 = vld [vmem:[#allocation6 + $0x158] sm:$0xff] }
  0x13   :  { %176 = vmatpush.msra.mxu1 %v85_v7  ;;  %214 = vmatpush.msra.mxu3 %v119_v16  ;;  %v65_v22 = vld [vmem:[#allocation6 + $0x40] sm:$0xff]  ;;  %v116_v25 = vld [vmem:[#allocation6 + $0x1d8] sm:$0xff]  ;;  %v99_v28 = vld [vmem:[#allocation6 + $0x150] sm:$0xff] }
  0x14   :  { %157 = vmatpush.msra.mxu0 %v68_v8  ;;  %v81_v23 = vld [vmem:[#allocation6 + $0xc0] sm:$0xff]  ;;  %195 = vmatpush.msra.mxu2 %v102_v15  ;;  %v64_v26 = vld [vmem:[#allocation6 + $0x38] sm:$0xff]  ;;  %v115_v29 = vld [vmem:[#allocation6 + $0x1d0] sm:$0xff] }
  0x15   :  { %177 = vmatpush.msra.mxu1 %v84_v9  ;;  %215 = vmatpush.msra.mxu3 %v118_v19  ;;  %v80_v27 = vld [vmem:[#allocation6 + $0xb8] sm:$0xff]  ;;  %v63_v30 = vld [vmem:[#allocation6 + $0x30] sm:$0xff]  ;;  %v98_v32 = vld [vmem:[#allocation6 + $0x148] sm:$0xff] }
  0x16   :  { %158 = vmatpush.msra.mxu0 %v67_v13  ;;  %196 = vmatpush.msra.mxu2 %v101_v20  ;;  %v79_v31 = vld [vmem:[#allocation6 + $0xb0] sm:$0xff]  ;;  %v114_v33 = vld [vmem:[#allocation6 + $0x1c8] sm:$0xff]  ;;  %v97_v36 = vld [vmem:[#allocation6 + $0x140] sm:$0xff] }
  0x17   :  { %178 = vmatpush.msra.mxu1 %v83_v14  ;;  %216 = vmatpush.msra.mxu3 %v117_v21  ;;  %v62_v34 = vld [vmem:[#allocation6 + $0x28] sm:$0xff]  ;;  %v113_v37 = vld [vmem:[#allocation6 + $0x1c0] sm:$0xff]  ;;  %v96_v40 = vld [vmem:[#allocation6 + $0x138] sm:$0xff] }
  0x18   :  { %159 = vmatpush.msra.mxu0 %v66_v17  ;;  %197 = vmatpush.msra.mxu2 %v100_v24  ;;  %v78_v35 = vld [vmem:[#allocation6 + $0xa8] sm:$0xff]  ;;  %v61_v38 = vld [vmem:[#allocation6 + $0x20] sm:$0xff]  ;;  %v112_v41 = vld [vmem:[#allocation6 + $0x1b8] sm:$0xff] }
  0x19   :  { %179 = vmatpush.msra.mxu1 %v82_v18  ;;  %217 = vmatpush.msra.mxu3 %v116_v25  ;;  %v77_v39 = vld [vmem:[#allocation6 + $0xa0] sm:$0xff]  ;;  %v60_v42 = vld [vmem:[#allocation6 + $0x18] sm:$0xff]  ;;  %v95_v44 = vld [vmem:[#allocation6 + $0x130] sm:$0xff] }
  0x1a   :  { %160 = vmatpush.msra.mxu0 %v65_v22  ;;  %198 = vmatpush.msra.mxu2 %v99_v28  ;;  %v76_v43 = vld [vmem:[#allocation6 + $0x98] sm:$0xff]  ;;  %v111_v45 = vld [vmem:[#allocation6 + $0x1b0] sm:$0xff]  ;;  %v94_v48 = vld [vmem:[#allocation6 + $0x128] sm:$0xff] }
  0x1b   :  { %180 = vmatpush.msra.mxu1 %v81_v23  ;;  %218 = vmatpush.msra.mxu3 %v115_v29  ;;  %v59_v46 = vld [vmem:[#allocation6 + $0x10] sm:$0xff]  ;;  %v110_v49 = vld [vmem:[#allocation6 + $0x1a8] sm:$0xff]  ;;  %v93_v52 = vld [vmem:[#allocation6 + $0x120] sm:$0xff] }
  0x1c   :  { %161 = vmatpush.msra.mxu0 %v64_v26  ;;  %199 = vmatpush.msra.mxu2 %v98_v32  ;;  %v75_v47 = vld [vmem:[#allocation6 + $0x90] sm:$0xff]  ;;  %v58_v50 = vld [vmem:[#allocation6 + $0x8] sm:$0xff]  ;;  %v109_v53 = vld [vmem:[#allocation6 + $0x1a0] sm:$0xff] }
  0x1d   :  { %181 = vmatpush.msra.mxu1 %v80_v27  ;;  %219 = vmatpush.msra.mxu3 %v114_v33  ;;  %v74_v51 = vld [vmem:[#allocation6 + $0x88] sm:$0xff]  ;;  %v57_v54 = vld [vmem:[#allocation6] sm:$0xff]  ;;  %v136_v56 = vld [vmem:[#allocation6 + $0x278] sm:$0xff] }
  0x1e   :  { %162 = vmatpush.msra.mxu0 %v63_v30  ;;  %200 = vmatpush.msra.mxu2 %v97_v36  ;;  %v73_v55 = vld [vmem:[#allocation6 + $0x80] sm:$0xff]  ;;  %v152_v57 = vld [vmem:[#allocation6 + $0x2f8] sm:$0xff]  ;;  %v135_v60 = vld [vmem:[#allocation6 + $0x270] sm:$0xff] }
  0x1f   :  { %182 = vmatpush.msra.mxu1 %v79_v31  ;;  %220 = vmatpush.msra.mxu3 %v113_v37  ;;  %v92_v58 = vld [vmem:[#allocation6 + $0x118] sm:$0xff]  ;;  %v151_v61 = vld [vmem:[#allocation6 + $0x2f0] sm:$0xff]  ;;  %v134_v0 = vld [vmem:[#allocation6 + $0x268] sm:$0xff] }
  0x20   :  { %163 = vmatpush.msra.mxu0 %v62_v34  ;;  %201 = vmatpush.msra.mxu2 %v96_v40  ;;  %v108_v59 = vld [vmem:[#allocation6 + $0x198] sm:$0xff]  ;;  %v91_v62 = vld [vmem:[#allocation6 + $0x110] sm:$0xff]  ;;  %v150_v1 = vld [vmem:[#allocation6 + $0x2e8] sm:$0xff] }
  0x21   :  { %183 = vmatpush.msra.mxu1 %v78_v35  ;;  %221 = vmatpush.msra.mxu3 %v112_v41  ;;  %v107_v63 = vld [vmem:[#allocation6 + $0x190] sm:$0xff]  ;;  %v90_v2 = vld [vmem:[#allocation6 + $0x108] sm:$0xff]  ;;  %v133_v4 = vld [vmem:[#allocation6 + $0x260] sm:$0xff] }
  0x22   :  { %164 = vmatpush.msra.mxu0 %v61_v38  ;;  %202 = vmatpush.msra.mxu2 %v95_v44  ;;  %v106_v3 = vld [vmem:[#allocation6 + $0x188] sm:$0xff]  ;;  %v149_v5 = vld [vmem:[#allocation6 + $0x2e0] sm:$0xff]  ;;  %v132_v8 = vld [vmem:[#allocation6 + $0x258] sm:$0xff] }
  0x23   :  { %184 = vmatpush.msra.mxu1 %v77_v39  ;;  %222 = vmatpush.msra.mxu3 %v111_v45  ;;  %v89_v6 = vld [vmem:[#allocation6 + $0x100] sm:$0xff]  ;;  %v148_v9 = vld [vmem:[#allocation6 + $0x2d8] sm:$0xff]  ;;  %v54_v11 = vld [vmem:[#allocation3 + $0x18] sm:$0xff] }
  0x24   :  { %165 = vmatpush.msra.mxu0 %v60_v42  ;;  %203 = vmatpush.msra.mxu2 %v94_v48  ;;  %v105_v7 = vld [vmem:[#allocation6 + $0x180] sm:$0xff]  ;;  %v131_v12 = vld [vmem:[#allocation6 + $0x250] sm:$0xff]  ;;  %v52_v15 = vld [vmem:[#allocation3 + $0x8] sm:$0xff] }
  0x25   :  { %185 = vmatpush.msra.mxu1 %v76_v43  ;;  %223 = vmatpush.msra.mxu3 %v110_v49  ;;  %v53_v10 = vld [vmem:[#allocation3 + $0x10] sm:$0xff]  ;;  %v147_v13 = vld [vmem:[#allocation6 + $0x2d0] sm:$0xff]  ;;  %v130_v16 = vld [vmem:[#allocation6 + $0x248] sm:$0xff] }
  0x26   :  { %166 = vmatpush.msra.mxu0 %v59_v46  ;;  %204 = vmatpush.msra.mxu2 %v93_v52  ;;  %v51_v14 = vld [vmem:[#allocation3] sm:$0xff]  ;;  %v146_v17 = vld [vmem:[#allocation6 + $0x2c8] sm:$0xff]  ;;  %v129_v18 = vld [vmem:[#allocation6 + $0x240] sm:$0xff] }
  0x27   :  { %186 = vmatpush.msra.mxu1 %v75_v47  ;;  %224 = vmatpush.msra.mxu3 %v109_v53  ;;  %v145_v19 = vld [vmem:[#allocation6 + $0x2c0] sm:$0xff]  ;;  %v128_v20 = vld [vmem:[#allocation6 + $0x238] sm:$0xff]  ;;  %v127_v22 = vld [vmem:[#allocation6 + $0x230] sm:$0xff] }
  0x28   :  { %167 = vmatpush.msra.mxu0 %v58_v50  ;;  %205 = vmatpush.msra.mxu2 %v92_v58  ;;  %v144_v21 = vld [vmem:[#allocation6 + $0x2b8] sm:$0xff]  ;;  %v143_v23 = vld [vmem:[#allocation6 + $0x2b0] sm:$0xff]  ;;  %v126_v24 = vld [vmem:[#allocation6 + $0x228] sm:$0xff] }
  0x29   :  { %187 = vmatpush.msra.mxu1 %v74_v51  ;;  %225 = vmatpush.msra.mxu3 %v108_v59  ;;  %v142_v25 = vld [vmem:[#allocation6 + $0x2a8] sm:$0xff]  ;;  %v125_v26 = vld [vmem:[#allocation6 + $0x220] sm:$0xff]  ;;  %v124_v28 = vld [vmem:[#allocation6 + $0x218] sm:$0xff] }
  0x2a   :  { %168 = vmatpush.msra.mxu0 %v57_v54  ;;  %206 = vmatpush.msra.mxu2 %v91_v62  ;;  %v141_v27 = vld [vmem:[#allocation6 + $0x2a0] sm:$0xff]  ;;  %v140_v29 = vld [vmem:[#allocation6 + $0x298] sm:$0xff]  ;;  %v123_v30 = vld [vmem:[#allocation6 + $0x210] sm:$0xff] }
  0x2b   :  { %188 = vmatpush.msra.mxu1 %v73_v55  ;;  %226 = vmatpush.msra.mxu3 %v107_v63  ;;  %v139_v31 = vld [vmem:[#allocation6 + $0x290] sm:$0xff]  ;;  %v122_v32 = vld [vmem:[#allocation6 + $0x208] sm:$0xff]  ;;  %v121_v34 = vld [vmem:[#allocation6 + $0x200] sm:$0xff] }
  0x2c   :  { %233 = vmatpush.msrb.mxu0 %v136_v56  ;;  %207 = vmatpush.msra.mxu2 %v90_v2  ;;  %v138_v33 = vld [vmem:[#allocation6 + $0x288] sm:$0xff]  ;;  %v137_v35 = vld [vmem:[#allocation6 + $0x280] sm:$0xff]  ;;  %v55_v36 = vld [vmem:[#allocation3 + $0x20] sm:$0xff] }
  0x2d   :  { %253 = vmatpush.msrb.mxu1 %v152_v57  ;;  %227 = vmatpush.msra.mxu3 %v106_v3  ;;  %v56_v37 = vld [vmem:[#allocation3 + $0x28] sm:$0xff]  ;;  %v308_v48 = vld [vmem:[%s426_s2] ss:$0 sm:$0xff] }
  0x2e   :  { %234 = vmatpush.msrb.mxu0 %v135_v60  ;;  %208 = vmatpush.msra.mxu2 %v89_v6 }
  0x2f   :  { %254 = vmatpush.msrb.mxu1 %v151_v61  ;;  %228 = vmatpush.msra.mxu3 %v105_v7 }
  0x30   :  { %235 = vmatpush.msrb.mxu0 %v134_v0  ;;  %209 = vmatmul.f32.vlgmr.msra.gmra.mxu2 %v53_v10 }
  0x31   :  { %255 = vmatpush.msrb.mxu1 %v150_v1  ;;  %229 = vmatmul.f32.vlgmr.msra.gmra.mxu3 %v54_v11 }
  0x32   :  { %236 = vmatpush.msrb.mxu0 %v133_v4  ;;  %189 = vmatmul.f32.vlgmr.msra.gmra.mxu1 %v52_v15 }
  0x33   :  { %256 = vmatpush.msrb.mxu1 %v149_v5  ;;  %169 = vmatmul.f32.vlgmr.msra.gmra.mxu0 %v51_v14 }
  0x34   :  { %237 = vmatpush.msrb.mxu0 %v132_v8 }
  0x35   :  { %257 = vmatpush.msrb.mxu1 %v148_v9 }
  0x36   :  { %238 = vmatpush.msrb.mxu0 %v131_v12 }
  0x37   :  { %258 = vmatpush.msrb.mxu1 %v147_v13 }
  0x38   :  { %239 = vmatpush.msrb.mxu0 %v130_v16 }
  0x39   :  { %259 = vmatpush.msrb.mxu1 %v146_v17 }
  0x3a   :  { %240 = vmatpush.msrb.mxu0 %v129_v18 }
  0x3b   :  { %260 = vmatpush.msrb.mxu1 %v145_v19 }
  0x3c   :  { %241 = vmatpush.msrb.mxu0 %v128_v20 }
  0x3d   :  { %261 = vmatpush.msrb.mxu1 %v144_v21 }
  0x3e   :  { %242 = vmatpush.msrb.mxu0 %v127_v22 }
  0x3f   :  { %262 = vmatpush.msrb.mxu1 %v143_v23 }
  0x40   :  { %243 = vmatpush.msrb.mxu0 %v126_v24 }
  0x41   :  { %263 = vmatpush.msrb.mxu1 %v142_v25 }
  0x42   :  { %244 = vmatpush.msrb.mxu0 %v125_v26 }
  0x43   :  { %264 = vmatpush.msrb.mxu1 %v141_v27 }
  0x44   :  { %245 = vmatpush.msrb.mxu0 %v124_v28 }
  0x45   :  { %265 = vmatpush.msrb.mxu1 %v140_v29 }
  0x46   :  { %246 = vmatpush.msrb.mxu0 %v123_v30 }
  0x47   :  { %266 = vmatpush.msrb.mxu1 %v139_v31 }
  0x48   :  { %247 = vmatpush.msrb.mxu0 %v122_v32 }
  0x49   :  { %267 = vmatpush.msrb.mxu1 %v138_v33 }
  0x4a   :  { %248 = vmatpush.msrb.mxu0 %v121_v34 }
  0x4b   :  { %268 = vmatpush.msrb.mxu1 %v137_v35  ;;  %249 = vmatmul.f32.vlgmr.msrb.gmra.mxu0 %v55_v36 }
  0x4c   :  { %269 = vmatmul.f32.vlgmr.msrb.gmra.mxu1 %v56_v37 }
  0xaf   :  { %v190_v39 = vpop.f32.mrf.mxu1 }
  0xb0   :  { %v170_v38 = vpop.f32.mrf.mxu0 }
  0xb1   :  { %v191_v40 = vadd.f32 %v190_v39, %v170_v38 }
  0xb3   :  { %v210_v41 = vpop.f32.mrf.mxu2 }
  0xb4   :  { %v211_v42 = vadd.f32 %v210_v41, %v191_v40  ;;  %v230_v43 = vpop.f32.mrf.mxu3 }
  0xb6   :  { %v231_v44 = vadd.f32 %v230_v43, %v211_v42 }
  0xc8   :  { %v250_v45 = vpop.f32.mrf.mxu0 }
  0xc9   :  { %v270_v46 = vpop.f32.mrf.mxu1  ;;  %v251_v47 = vadd.f32 %v250_v45, %v231_v44 }
  0xcb   :  { %v271_v49 = vadd.f32 %v270_v46, %v251_v47 }
  0xcd   :  { %v283_v50 = vadd.f32 %v308_v48, %v271_v49 }
  0xcf   :  { %284 = vst [vmem:[#allocation8] sm:$0xff] %v283_v50 }
  0xd0   :  { %295 = dma.vmem_to_hbm [thread:$0]  %s291_s25, 128, %s293_s28, [#allocation5]  }
  0xd1   :  { %385 = dma.done.wait [#allocation5], 128  }
  0xd2   :  { %386 = vsyncadd [#allocation5], 4294967168 }
  0xd3   :  { %300 = vsyncpa [#allocation4], 1 }
  0xd4   :  { %301 = vsyncpa [#allocation7], 1 }
  0xd5   :  { %302 = vsyncpa [#allocation5], 1 }

</bundles_post_ra>
